<compile_context>
chip_gen: v6e
topology: v6e:2x2x1
jax: 0.10.0
libtpu: 0.0.40
codegen_flags: <defaults>
</compile_context>

<pallas_src>
import jax
import jax.numpy as jnp
from jax.experimental import pallas as pl
from jax.experimental.pallas import tpu as pltpu

_IN_FEATURES = 300   # 10 * 10 * 3
_H1 = 84             # fc1 output features
_H1_PAD = 128        # fc1/fc2/fc3 working width, padded to a full lane group
_ONES_LANE = 127     # lane forced to 1.0 in h1/h2 to fold the fc2/fc3 biases

_MIB = 1024 * 1024


def _round_up(n, m):
    return ((n + m - 1) // m) * m


def _default_tiling():
    """Pick (batch tile, scoped-VMEM limit) per TPU generation."""
    vmem_cap = None
    try:
        vmem_cap = getattr(pltpu.get_tpu_info(), "vmem_capacity_bytes", None)
    except Exception:
        vmem_cap = None
    if vmem_cap is not None and vmem_cap >= 100 * _MIB:
        # v5e / v6e: 128 MiB VMEM per core -> large tile, raised scoped limit.
        return 8192, 96 * _MIB
    # v7x (64 MiB per TC) or unknown chip: conservative but still well-amortized.
    return 4096, 48 * _MIB


def _regressnet_kernel(x_ref, w1_ref, b1_ref, w2_ref, w3_ref, o_ref):
    # x_ref : (TB, 300) f32        w1_ref: (300, 128) f32
    # b1_ref: (1, 128)  f32        w2_ref: (128, 128) f32   w3_ref: (128, 128) f32
    x = x_ref[...]

    # fc1 on the MXU (f32 operands, f32 accumulation).  Lane 127 of b1 is 1.0 and
    # column 127 of w1 is all-zero, so after ReLU h1[:, 127] == 1.0 exactly.
    h1 = jnp.dot(x, w1_ref[...], preferred_element_type=jnp.float32)   # (TB, 128)
    h1 = jnp.maximum(h1 + b1_ref[...], 0.0)

    # fc2 (84 -> 3) on the MXU.  b2 rides along on the ones-lane of h1, and
    # w2_pad[127, 127] = 1.0 re-creates the constant-one lane in h2 for fc3.
    h2 = jnp.dot(h1, w2_ref[...], preferred_element_type=jnp.float32)  # (TB, 128)
    h2 = jnp.maximum(h2, 0.0)                                          # relu(1)=1

    # fc3 (3 -> 1) on the MXU with b3 folded via the ones-lane; lane 0 is the
    # final pre-activation.
    y = jnp.dot(h2, w3_ref[...], preferred_element_type=jnp.float32)   # (TB, 128)
    o_ref[...] = jnp.maximum(y[:, 0:1], 0.0).astype(o_ref.dtype)


def _pack_params(params):
    """Pad/pack the tiny weights into four resident f32 VMEM operands."""
    w1 = params["w1"].astype(jnp.float32)               # (300, 84)
    b1 = params["b1"].reshape(-1).astype(jnp.float32)   # (84,)
    w2 = params["w2"].astype(jnp.float32)               # (84, 3)
    b2 = params["b2"].reshape(-1).astype(jnp.float32)   # (3,)
    w3 = params["w3"].reshape(-1).astype(jnp.float32)   # (3,)
    b3 = params["b3"].reshape(-1).astype(jnp.float32)   # (1,)

    # Ones-lane trick preconditions (guards future width changes).
    assert _H1 < _ONES_LANE, "fc1 outputs would collide with the ones-lane"
    assert w2.shape == (_H1, 3) and w1.shape == (_IN_FEATURES, _H1)

    # fc1: pad output dim 84 -> 128 (column 127 stays all-zero).
    w1p = jnp.zeros((_IN_FEATURES, _H1_PAD), jnp.float32).at[:, :_H1].set(w1)
    b1p = jnp.zeros((1, _H1_PAD), jnp.float32).at[0, :_H1].set(b1)
    b1p = b1p.at[0, _ONES_LANE].set(1.0)           # constant-one feature of h1

    # fc2: (128, 128) with weights in rows 0..83 / cols 0..2, b2 on the
    # ones-lane row, and a pass-through 1.0 so h2 keeps a ones-lane.
    w2p = jnp.zeros((_H1_PAD, _H1_PAD), jnp.float32)
    w2p = w2p.at[:_H1, :3].set(w2)
    w2p = w2p.at[_ONES_LANE, :3].set(b2)
    w2p = w2p.at[_ONES_LANE, _ONES_LANE].set(1.0)

    # fc3: (128, 128) with weights in rows 0..2 / col 0 and b3 on the ones-lane.
    w3p = jnp.zeros((_H1_PAD, _H1_PAD), jnp.float32)
    w3p = w3p.at[:3, 0].set(w3)
    w3p = w3p.at[_ONES_LANE, 0].set(b3[0])
    return w1p, b1p, w2p, w3p


def regressnet_forward(x_nchw, params, *, block_rows=None):
    """x_nchw: (B, 3, 10, 10) float32 -> (B, 1) float32."""
    B = x_nchw.shape[0]
    x_flat = x_nchw.reshape(B, _IN_FEATURES)   # matches torch.flatten(x, 1)
    w1p, b1p, w2p, w3p = _pack_params(params)

    if block_rows is None:
        block_rows, vmem_limit = _default_tiling()
    else:
        vmem_limit = 48 * _MIB                 # safe on every generation

    # Batch tile: multiple of 8 sublanes, capped so small B doesn't over-allocate.
    tb = _round_up(min(block_rows, _round_up(B, 8)), 8)
    grid = (pl.cdiv(B, tb),)

    cost = pl.CostEstimate(
        flops=2 * B * (_IN_FEATURES * _H1_PAD + 2 * _H1_PAD * _H1_PAD),
        transcendentals=0,
        bytes_accessed=(x_flat.size * 4 + B * 4
                        + (w1p.size + b1p.size + w2p.size + w3p.size) * 4),
    )

    return pl.pallas_call(
        _regressnet_kernel,
        out_shape=jax.ShapeDtypeStruct((B, 1), jnp.float32),
        grid=grid,
        in_specs=[
            # streamed batch blocks of x
            pl.BlockSpec((tb, _IN_FEATURES), lambda i: (i, 0)),
            # weights: resident across the whole grid (block index fixed at 0)
            pl.BlockSpec((_IN_FEATURES, _H1_PAD), lambda i: (0, 0)),
            pl.BlockSpec((1, _H1_PAD), lambda i: (0, 0)),
            pl.BlockSpec((_H1_PAD, _H1_PAD), lambda i: (0, 0)),
            pl.BlockSpec((_H1_PAD, _H1_PAD), lambda i: (0, 0)),
        ],
        out_specs=pl.BlockSpec((tb, 1), lambda i: (i, 0)),
        compiler_params=pltpu.CompilerParams(
            dimension_semantics=("parallel",),   # v7x: shard batch over 2 TCs
            vmem_limit_bytes=vmem_limit,
        ),
        cost_estimate=cost,
    )(x_flat, w1p, b1p, w2p, w3p)


def init_params(key):
    """Deterministic init mimicking PyTorch nn.Linear default:
    U(-1/sqrt(fan_in), 1/sqrt(fan_in)) for both weight and bias.
    Weights stored as (in, out) so the forward does x @ W."""
    dims = [(_IN_FEATURES, _H1), (_H1, 3), (3, 1)]
    params = {}
    for i, (fin, fout) in enumerate(dims, start=1):
        key, kw, kb = jax.random.split(key, 3)
        bound = 1.0 / (fin ** 0.5)
        params[f"w{i}"] = jax.random.uniform(
            kw, (fin, fout), jnp.float32, minval=-bound, maxval=bound)
        params[f"b{i}"] = jax.random.uniform(
            kb, (1, fout), jnp.float32, minval=-bound, maxval=bound)
    return params


def _reference_forward(x_nchw, params):
    xf = x_nchw.reshape(x_nchw.shape[0], -1)
    h1 = jnp.maximum(xf @ params["w1"] + params["b1"], 0.0)
    h2 = jnp.maximum(h1 @ params["w2"] + params["b2"], 0.0)
    return jnp.maximum(h2 @ params["w3"] + params["b3"], 0.0)


if __name__ == "__main__":
    key = jax.random.PRNGKey(0)
    key, kx = jax.random.split(key)

    # Small deterministic input consistent with fc1 expecting 10*10*3 features.
    x = jax.random.normal(kx, (2, 3, 10, 10), dtype=jnp.float32)
    params = init_params(key)

    fwd = jax.jit(regressnet_forward, static_argnames=("block_rows",))
    out = jax.block_until_ready(fwd(x, params))
    assert out.shape == (2, 1)
    assert out.dtype == jnp.float32
    assert jnp.allclose(out, _reference_forward(x, params), atol=1e-2, rtol=1e-2)

    # Guard: B not a multiple of the batch tile (partial last block masking).
    key, kx2 = jax.random.split(key)
    x2 = jax.random.normal(kx2, (10, 3, 10, 10), dtype=jnp.float32)
    out2 = jax.block_until_ready(fwd(x2, params, block_rows=8))  # grid of 2 blocks
    assert out2.shape == (10, 1)
    assert jnp.allclose(out2, _reference_forward(x2, params), atol=1e-2, rtol=1e-2)

    print("KERNEL_OK")
</pallas_src>

<mosaic_0001>
module attributes {stable_mosaic.version = 11 : i64} {
  func.func @_regressnet_kernel(%arg0: i32, %arg1: memref<8x300xf32, #tpu.memory_space<vmem>>, %arg2: memref<300x128xf32, #tpu.memory_space<vmem>>, %arg3: memref<1x128xf32, #tpu.memory_space<vmem>>, %arg4: memref<128x128xf32, #tpu.memory_space<vmem>>, %arg5: memref<128x128xf32, #tpu.memory_space<vmem>>, %arg6: memref<8x1xf32, #tpu.memory_space<vmem>>) attributes {dimension_semantics = [#tpu.dimension_semantics<parallel>], iteration_bounds = array<i64: 1>, scalar_prefetch = 0 : i64, scratch_operands = 0 : i64, tpu.core_type = #tpu.core_type<tc>, window_params = [{transform_indices = @transform_0, window_bounds = array<i64: 8, 300>}, {pipeline_mode = #tpu.pipeline_mode<synchronous>, transform_indices = @transform_1, window_bounds = array<i64: 300, 128>}, {pipeline_mode = #tpu.pipeline_mode<synchronous>, transform_indices = @transform_2, window_bounds = array<i64: 1, 128>}, {pipeline_mode = #tpu.pipeline_mode<synchronous>, transform_indices = @transform_3, window_bounds = array<i64: 128, 128>}, {pipeline_mode = #tpu.pipeline_mode<synchronous>, transform_indices = @transform_4, window_bounds = array<i64: 128, 128>}, {transform_indices = @transform_5, window_bounds = array<i64: 8, 1>}]} {
    %c0 = arith.constant 0 : index
    %c0_0 = arith.constant 0 : index
    %0 = vector.load %arg1[%c0, %c0_0] : memref<8x300xf32, #tpu.memory_space<vmem>>, vector<8x300xf32>
    %c0_1 = arith.constant 0 : index
    %c0_2 = arith.constant 0 : index
    %1 = vector.load %arg2[%c0_1, %c0_2] : memref<300x128xf32, #tpu.memory_space<vmem>>, vector<300x128xf32>
    %cst = arith.constant dense<0.000000e+00> : vector<8x128xf32>
    %2 = tpu.matmul %0, %1, %cst {dimension_numbers = #tpu.dot_dimension_numbers<[1], [0], [0], [1], [0, 0, 1, 1], [], []>} : vector<8x300xf32>, vector<300x128xf32>, vector<8x128xf32> -> vector<8x128xf32>
    %c0_3 = arith.constant 0 : index
    %c0_4 = arith.constant 0 : index
    %3 = vector.load %arg3[%c0_3, %c0_4] : memref<1x128xf32, #tpu.memory_space<vmem>>, vector<1x128xf32>
    %4 = vector.broadcast %3 : vector<1x128xf32> to vector<8x128xf32>
    %5 = arith.addf %2, %4 : vector<8x128xf32>
    %cst_5 = arith.constant 0.000000e+00 : f32
    %6 = vector.broadcast %cst_5 : f32 to vector<8x128xf32>
    %7 = arith.maximumf %5, %6 : vector<8x128xf32>
    %c0_6 = arith.constant 0 : index
    %c0_7 = arith.constant 0 : index
    %8 = vector.load %arg4[%c0_6, %c0_7] : memref<128x128xf32, #tpu.memory_space<vmem>>, vector<128x128xf32>
    %cst_8 = arith.constant dense<0.000000e+00> : vector<8x128xf32>
    %9 = tpu.matmul %7, %8, %cst_8 {dimension_numbers = #tpu.dot_dimension_numbers<[1], [0], [0], [1], [0, 0, 1, 1], [], []>} : vector<8x128xf32>, vector<128x128xf32>, vector<8x128xf32> -> vector<8x128xf32>
    %cst_9 = arith.constant 0.000000e+00 : f32
    %10 = vector.broadcast %cst_9 : f32 to vector<8x128xf32>
    %11 = arith.maximumf %9, %10 : vector<8x128xf32>
    %c0_10 = arith.constant 0 : index
    %c0_11 = arith.constant 0 : index
    %12 = vector.load %arg5[%c0_10, %c0_11] : memref<128x128xf32, #tpu.memory_space<vmem>>, vector<128x128xf32>
    %cst_12 = arith.constant dense<0.000000e+00> : vector<8x128xf32>
    %13 = tpu.matmul %11, %12, %cst_12 {dimension_numbers = #tpu.dot_dimension_numbers<[1], [0], [0], [1], [0, 0, 1, 1], [], []>} : vector<8x128xf32>, vector<128x128xf32>, vector<8x128xf32> -> vector<8x128xf32>
    %14 = vector.extract_strided_slice %13 {offsets = [0, 0], sizes = [8, 1], strides = [1, 1]} : vector<8x128xf32> to vector<8x1xf32>
    %cst_13 = arith.constant 0.000000e+00 : f32
    %15 = vector.broadcast %cst_13 : f32 to vector<8x1xf32>
    %16 = arith.maximumf %14, %15 : vector<8x1xf32>
    %c0_14 = arith.constant 0 : index
    %c0_15 = arith.constant 0 : index
    %17 = vector.load %arg6[%c0_14, %c0_15] : memref<8x1xf32, #tpu.memory_space<vmem>>, vector<8x1xf32>
    tpu.vector_store %arg6[%c0_14, %c0_15], %16 {strides = array<i32>} : memref<8x1xf32, #tpu.memory_space<vmem>>, vector<8x1xf32>,
    return
  }
  func.func @transform_0(%arg0: i32) -> (i32, i32) {
    %c0_i32 = arith.constant 0 : i32
    %c0_i32_0 = arith.constant 0 : i32
    return %arg0, %c0_i32 : i32, i32
  }
  func.func @transform_1(%arg0: i32) -> (i32, i32) {
    %c0_i32 = arith.constant 0 : i32
    %c0_i32_0 = arith.constant 0 : i32
    %c0_i32_1 = arith.constant 0 : i32
    return %c0_i32, %c0_i32_0 : i32, i32
  }
  func.func @transform_2(%arg0: i32) -> (i32, i32) {
    %c0_i32 = arith.constant 0 : i32
    %c0_i32_0 = arith.constant 0 : i32
    %c0_i32_1 = arith.constant 0 : i32
    return %c0_i32, %c0_i32_0 : i32, i32
  }
  func.func @transform_3(%arg0: i32) -> (i32, i32) {
    %c0_i32 = arith.constant 0 : i32
    %c0_i32_0 = arith.constant 0 : i32
    %c0_i32_1 = arith.constant 0 : i32
    return %c0_i32, %c0_i32_0 : i32, i32
  }
  func.func @transform_4(%arg0: i32) -> (i32, i32) {
    %c0_i32 = arith.constant 0 : i32
    %c0_i32_0 = arith.constant 0 : i32
    %c0_i32_1 = arith.constant 0 : i32
    return %c0_i32, %c0_i32_0 : i32, i32
  }
  func.func @transform_5(%arg0: i32) -> (i32, i32) {
    %c0_i32 = arith.constant 0 : i32
    %c0_i32_0 = arith.constant 0 : i32
    return %arg0, %c0_i32 : i32, i32
  }
}

</mosaic_0001>

<bundles_post_ra>
// kernel: regressnet_forward.1
= control target key start
LH: loop header
LB: loop body
LE: loop exit
PB: predicated region body
PF: predicated region fallthrough
CT: control target
= control target key end

     0   :  { %v648_v4 = vmov 0.0   ;;  %vm649_vm0 = vmmov 0   ;;  %v650_v7 = vmov 1983009808   ;;  %v80_v9 = vlaneseq  ;;  %s957_s0 = inlined_call_operand.vmem [shape: f32[2,300], index: 0, kind: input, shape index: {}]   ;;  %s958_s1 = inlined_call_operand.vmem [shape: f32[300,128], index: 1, kind: input, shape index: {}]   ;;  %s959_s2 = inlined_call_operand.vmem [shape: f32[1,128], index: 2, kind: input, shape index: {}]   ;;  %s960_s3 = inlined_call_operand.vmem [shape: f32[128,128], index: 3, kind: input, shape index: {}]   ;;  %s961_s4 = inlined_call_operand.vmem [shape: f32[128,128], index: 4, kind: input, shape index: {}]   ;;  %s962_s5 = inlined_call_operand.vmem [shape: f32[2,1], index: 5, kind: output, shape index: {}]  }
   0x1   :  { %v55_v0 = vld [vmem:[%s958_s1 + $0xf8] sm:$0xff]  ;;  %v54_v2 = vld [vmem:[%s958_s1 + $0xf0] sm:$0xff]  ;;  %554 = vmatprep.subr.mxu1 %v648_v4  ;;  %v53_v5 = vld [vmem:[%s958_s1 + $0xe8] sm:$0xff]  ;;  %566 = vmatprep.mubr.msk.f32.mxu1 %vm649_vm0, %v648_v4  ;;  %v78_v8 = vunpack.c.l.s4 %v650_v7  ;;  %vm113_vm1 = vcmask 1043456   ;;  %vm110_vm2 = vcmask 359424   ;;  %vm432_vm3 = vcmask 7168  }
   0x2   :  { %v39_v1 = vld [vmem:[%s958_s1 + $0x78] sm:$0xff]  ;;  %478 = vmatprep.subr.mxu0 %v55_v0  ;;  %v38_v3 = vld [vmem:[%s958_s1 + $0x70] sm:$0xff]  ;;  %v37_v6 = vld [vmem:[%s958_s1 + $0x68] sm:$0xff]  ;;  %v81_v15 = vshrl.u32 %v80_v9, 7 }
   0x3   :  { %479 = vmatpush3.msra.mxu0 %v39_v1  ;;  %v52_v10 = vld [vmem:[%s958_s1 + $0xe0] sm:$0xff]  ;;  %v51_v12 = vld [vmem:[%s958_s1 + $0xd8] sm:$0xff]  ;;  %v79_v14 = vunpack.c.0.s8 %v78_v8  ;;  %v50_v16 = vld [vmem:[%s958_s1 + $0xd0] sm:$0xff] }
   0x4   :  { %480 = vmatprep.subr.mxu0 %v54_v2  ;;  %v36_v11 = vld [vmem:[%s958_s1 + $0x60] sm:$0xff]  ;;  %v35_v13 = vld [vmem:[%s958_s1 + $0x58] sm:$0xff]  ;;  %v61_v17 = vld [vmem:[%s958_s1 + $0x128] sm:$0xf] }
   0x5   :  { %481 = vmatpush3.msra.mxu0 %v38_v3  ;;  %v34_v18 = vld [vmem:[%s958_s1 + $0x50] sm:$0xff]  ;;  %555 = vmatpush3.msk.msra.mxu1 %vm113_vm1, %v61_v17  ;;  %v60_v19 = vld [vmem:[%s958_s1 + $0x120] sm:$0xff]  ;;  %v49_v20 = vld [vmem:[%s958_s1 + $0xc8] sm:$0xff]  ;;  %v82_v25 = vsub.s32 %v79_v14, %v81_v15 }
   0x6   :  { %482 = vmatprep.subr.mxu0 %v53_v5  ;;  %v33_v21 = vld [vmem:[%s958_s1 + $0x48] sm:$0xff]  ;;  %556 = vmatprep.subr.mxu1 %v648_v4  ;;  %v59_v22 = vld [vmem:[%s958_s1 + $0x118] sm:$0xff]  ;;  %v48_v23 = vld [vmem:[%s958_s1 + $0xc0] sm:$0xff] }
   0x7   :  { %483 = vmatpush3.msra.mxu0 %v37_v6  ;;  %v32_v24 = vld [vmem:[%s958_s1 + $0x40] sm:$0xff]  ;;  %557 = vmatpush3.msra.mxu1 %v60_v19  ;;  %v47_v26 = vld [vmem:[%s958_s1 + $0xb8] sm:$0xff]  ;;  %v58_v29 = vld [vmem:[%s958_s1 + $0x110] sm:$0xff] }
   0x8   :  { %484 = vmatprep.subr.mxu0 %v52_v10  ;;  %558 = vmatprep.subr.mxu1 %v648_v4  ;;  %v642_v27 = vld [vmem:[%s957_s0] ss:$6 sps:$4 sm:$0xff]   ;;  %v644_v28 = vld [vmem:[%s957_s0 + $0x4] ss:$6 sps:$4 sm:$0x33]   ;;  %v31_v33 = vld [vmem:[%s958_s1 + $0x38] sm:$0xff] }
   0x9   :  { %485 = vmatpush3.msra.mxu0 %v36_v11  ;;  %559 = vmatpush3.msra.mxu1 %v59_v22  ;;  %v645_v30 = vld [vmem:[%s957_s0 + $0xc] ss:$6 sps:$4 sm:$0xff]   ;;  %v647_v31 = vld [vmem:[%s957_s0 + $0x10] ss:$6 sps:$4 sm:$0x33]   ;;  %v768_v34 = vrot.slane %v642_v27, %v82_v25  ;;  %v90_v35 = vrot.slane %v644_v28, %v82_v25  ;;  %v56_v39 = vld [vmem:[%s958_s1 + $0x100] sm:$0xff] }
   0xa   :  { %486 = vmatprep.subr.mxu0 %v51_v12  ;;  %560 = vmatprep.subr.mxu1 %v648_v4  ;;  %v57_v32 = vld [vmem:[%s958_s1 + $0x108] sm:$0xff]  ;;  %v46_v36 = vld [vmem:[%s958_s1 + $0xb0] sm:$0xff]  ;;  %v97_v37 = vrot.slane %v645_v30, %v82_v25  ;;  %v104_v38 = vrot.slane %v647_v31, %v82_v25  ;;  %v44_v45 = vld [vmem:[%s958_s1 + $0xa0] sm:$0xff] }
   0xb   :  { %487 = vmatpush3.msra.mxu0 %v35_v13  ;;  %561 = vmatpush3.msra.mxu1 %v58_v29  ;;  %v30_v40 = vld [vmem:[%s958_s1 + $0x30] sm:$0xff]  ;;  %v45_v41 = vld [vmem:[%s958_s1 + $0xa8] sm:$0xff]  ;;  %v273_v46 = vld [vmem:[%s960_s3 + $0x78] sm:$0xff] }
   0xc   :  { %488 = vmatprep.subr.mxu0 %v50_v16  ;;  %562 = vmatprep.subr.mxu1 %v648_v4  ;;  %v106_v42 = vcombine.high %v768_v34, %v97_v37  ;;  %v107_v43 = vcombine.low %v90_v35, %v104_v38  ;;  %v29_v44 = vld [vmem:[%s958_s1 + $0x28] sm:$0xff]  ;;  %v28_v47 = vld [vmem:[%s958_s1 + $0x20] sm:$0xff]  ;;  %v43_v48 = vld [vmem:[%s958_s1 + $0x98] sm:$0xff]  ;;  %v105_v60 = vcombine.low %v768_v34, %v97_v37 }
   0xd   :  { %489 = vmatpush3.msra.mxu0 %v34_v18  ;;  %563 = vmatpush3.msra.mxu1 %v57_v32  ;;  %v272_v49 = vld [vmem:[%s960_s3 + $0x70] sm:$0xff]  ;;  %v27_v50 = vld [vmem:[%s958_s1 + $0x18] sm:$0xff]  ;;  %v271_v52 = vld [vmem:[%s960_s3 + $0x68] sm:$0xff] }
   0xe   :  { %490 = vmatprep.subr.mxu0 %v49_v20  ;;  %564 = vmatprep.subr.mxu1 %v648_v4  ;;  %v42_v51 = vld [vmem:[%s958_s1 + $0x90] sm:$0xff]  ;;  %v41_v54 = vld [vmem:[%s958_s1 + $0x88] sm:$0xff]  ;;  %v270_v55 = vld [vmem:[%s960_s3 + $0x60] sm:$0xff] }
   0xf   :  { %491 = vmatpush3.msra.mxu0 %v33_v21  ;;  %565 = vmatpush3.msra.mxu1 %v56_v39  ;;  %v26_v53 = vld [vmem:[%s958_s1 + $0x10] sm:$0xff]  ;;  %v25_v56 = vld [vmem:[%s958_s1 + $0x8] sm:$0xff]  ;;  %v40_v57 = vld [vmem:[%s958_s1 + $0x80] sm:$0xff] }
  0x10   :  { %492 = vmatprep.subr.mxu0 %v48_v23  ;;  %181 = vmatprep.mubr.f32.mxu0 %v106_v42  ;;  %v269_v58 = vld [vmem:[%s960_s3 + $0x58] sm:$0xff]  ;;  %v24_v59 = vld [vmem:[%s958_s1] sm:$0xff]  ;;  %v268_v61 = vld [vmem:[%s960_s3 + $0x50] sm:$0xff] }
  0x11   :  { %493 = vmatpush3.msra.mxu0 %v32_v24  ;;  %567 = vmatmul.mubr.msk.f32.vlgmr.msra.gmra.mxu1 %vm110_vm2, %v107_v43  ;;  %v267_v62 = vld [vmem:[%s960_s3 + $0x48] sm:$0xff]  ;;  %v266_v63 = vld [vmem:[%s960_s3 + $0x40] sm:$0xff]  ;;  %v265_v0 = vld [vmem:[%s960_s3 + $0x38] sm:$0xff] }
  0x12   :  { %494 = vmatprep.subr.mxu0 %v47_v26  ;;  %569 = vmatprep.subr.mxu1 %v648_v4  ;;  %v264_v1 = vld [vmem:[%s960_s3 + $0x30] sm:$0xff]  ;;  %v263_v2 = vld [vmem:[%s960_s3 + $0x28] sm:$0xff]  ;;  %v262_v3 = vld [vmem:[%s960_s3 + $0x20] sm:$0xff] }
  0x13   :  { %495 = vmatpush3.msra.mxu0 %v31_v33  ;;  %570 = vmatpush3.msra.mxu1 %v273_v46  ;;  %v261_v5 = vld [vmem:[%s960_s3 + $0x18] sm:$0xff]  ;;  %v260_v6 = vld [vmem:[%s960_s3 + $0x10] sm:$0xff]  ;;  %v259_v7 = vld [vmem:[%s960_s3 + $0x8] sm:$0xff] }
  0x14   :  { %496 = vmatprep.subr.mxu0 %v46_v36  ;;  %571 = vmatprep.subr.mxu1 %v648_v4  ;;  %v258_v8 = vld [vmem:[%s960_s3] sm:$0xff]  ;;  %v360_v9 = vld [vmem:[%s961_s4 + $0x78] sm:$0xff]  ;;  %v359_v10 = vld [vmem:[%s961_s4 + $0x70] sm:$0xff] }
  0x15   :  { %497 = vmatpush3.msra.mxu0 %v30_v40  ;;  %572 = vmatpush3.msra.mxu1 %v272_v49  ;;  %v358_v11 = vld [vmem:[%s961_s4 + $0x68] sm:$0xff]  ;;  %v357_v12 = vld [vmem:[%s961_s4 + $0x60] sm:$0xff]  ;;  %v356_v13 = vld [vmem:[%s961_s4 + $0x58] sm:$0xff] }
  0x16   :  { %498 = vmatprep.subr.mxu0 %v45_v41  ;;  %573 = vmatprep.subr.mxu1 %v648_v4  ;;  %v355_v14 = vld [vmem:[%s961_s4 + $0x50] sm:$0xff]  ;;  %v354_v15 = vld [vmem:[%s961_s4 + $0x48] sm:$0xff]  ;;  %v353_v16 = vld [vmem:[%s961_s4 + $0x40] sm:$0xff] }
  0x17   :  { %499 = vmatpush3.msra.mxu0 %v29_v44  ;;  %574 = vmatpush3.msra.mxu1 %v271_v52  ;;  %v352_v17 = vld [vmem:[%s961_s4 + $0x38] sm:$0xff]  ;;  %v351_v18 = vld [vmem:[%s961_s4 + $0x30] sm:$0xff]  ;;  %v350_v19 = vld [vmem:[%s961_s4 + $0x28] sm:$0xff] }
  0x18   :  { %500 = vmatprep.subr.mxu0 %v44_v45  ;;  %575 = vmatprep.subr.mxu1 %v648_v4  ;;  %v349_v20 = vld [vmem:[%s961_s4 + $0x20] sm:$0xff]  ;;  %v348_v21 = vld [vmem:[%s961_s4 + $0x18] sm:$0xff]  ;;  %v347_v22 = vld [vmem:[%s961_s4 + $0x10] sm:$0xff] }
  0x19   :  { %501 = vmatpush3.msra.mxu0 %v28_v47  ;;  %576 = vmatpush3.msra.mxu1 %v270_v55  ;;  %v475_v27 = vld [vmem:[%s959_s2] ss:$0 sm:$0xff]  ;;  %v346_v32 = vld [vmem:[%s961_s4 + $0x8] sm:$0xff] }
  0x1a   :  { %502 = vmatprep.subr.mxu0 %v43_v48  ;;  %577 = vmatprep.subr.mxu1 %v648_v4  ;;  %v345_v33 = vld [vmem:[%s961_s4] sm:$0xff] }
  0x1b   :  { %503 = vmatpush3.msra.mxu0 %v27_v50  ;;  %578 = vmatpush3.msra.mxu1 %v269_v58 }
  0x1c   :  { %504 = vmatprep.subr.mxu0 %v42_v51  ;;  %579 = vmatprep.subr.mxu1 %v648_v4 }
  0x1d   :  { %505 = vmatpush3.msra.mxu0 %v26_v53  ;;  %580 = vmatpush3.msra.mxu1 %v268_v61 }
  0x1e   :  { %506 = vmatprep.subr.mxu0 %v41_v54  ;;  %581 = vmatprep.subr.mxu1 %v648_v4 }
  0x1f   :  { %507 = vmatpush3.msra.mxu0 %v25_v56  ;;  %601 = vmatprep.mubr.msk.f32.mxu1 %vm649_vm0, %v648_v4 }
  0x20   :  { %508 = vmatprep.subr.mxu0 %v40_v57  ;;  %582 = vmatpush3.msra.mxu1 %v267_v62 }
  0x21   :  { %509 = vmatpush3.msra.mxu0 %v24_v59  ;;  %583 = vmatprep.subr.mxu1 %v648_v4 }
  0x22   :  { %182 = vmatmul.mubr.f32.vlgmr.msra.gmra.mxu0 %v105_v60  ;;  %604 = vmatprep.subr.mxu0 %v648_v4 }
  0x23   :  { %636 = vmatprep.mubr.msk.f32.mxu0 %vm649_vm0, %v648_v4  ;;  %584 = vmatpush3.msra.mxu1 %v266_v63 }
  0x24   :  { %585 = vmatprep.subr.mxu1 %v648_v4  ;;  %605 = vmatpush3.msra.mxu0 %v360_v9 }
  0x25   :  { %586 = vmatpush3.msra.mxu1 %v265_v0  ;;  %606 = vmatprep.subr.mxu0 %v648_v4 }
  0x26   :  { %587 = vmatprep.subr.mxu1 %v648_v4  ;;  %607 = vmatpush3.msra.mxu0 %v359_v10 }
  0x27   :  { %588 = vmatpush3.msra.mxu1 %v264_v1  ;;  %608 = vmatprep.subr.mxu0 %v648_v4 }
  0x28   :  { %589 = vmatprep.subr.mxu1 %v648_v4  ;;  %609 = vmatpush3.msra.mxu0 %v358_v11 }
  0x29   :  { %590 = vmatpush3.msra.mxu1 %v263_v2  ;;  %610 = vmatprep.subr.mxu0 %v648_v4 }
  0x2a   :  { %591 = vmatprep.subr.mxu1 %v648_v4  ;;  %611 = vmatpush3.msra.mxu0 %v357_v12 }
  0x2b   :  { %592 = vmatpush3.msra.mxu1 %v262_v3  ;;  %612 = vmatprep.subr.mxu0 %v648_v4 }
  0x2c   :  { %593 = vmatprep.subr.mxu1 %v648_v4  ;;  %613 = vmatpush3.msra.mxu0 %v356_v13 }
  0x2d   :  { %594 = vmatpush3.msra.mxu1 %v261_v5  ;;  %614 = vmatprep.subr.mxu0 %v648_v4 }
  0x2e   :  { %595 = vmatprep.subr.mxu1 %v648_v4  ;;  %615 = vmatpush3.msra.mxu0 %v355_v14 }
  0x2f   :  { %596 = vmatpush3.msra.mxu1 %v260_v6  ;;  %616 = vmatprep.subr.mxu0 %v648_v4 }
  0x30   :  { %597 = vmatprep.subr.mxu1 %v648_v4  ;;  %617 = vmatpush3.msra.mxu0 %v354_v15 }
  0x31   :  { %598 = vmatpush3.msra.mxu1 %v259_v7  ;;  %618 = vmatprep.subr.mxu0 %v648_v4 }
  0x32   :  { %599 = vmatprep.subr.mxu1 %v648_v4  ;;  %619 = vmatpush3.msra.mxu0 %v353_v16 }
  0x33   :  { %600 = vmatpush3.msra.mxu1 %v258_v8  ;;  %620 = vmatprep.subr.mxu0 %v648_v4 }
  0x34   :  { %621 = vmatpush3.msra.mxu0 %v352_v17 }
  0x35   :  { %622 = vmatprep.subr.mxu0 %v648_v4 }
  0x36   :  { %623 = vmatpush3.msra.mxu0 %v351_v18 }
  0x37   :  { %624 = vmatprep.subr.mxu0 %v648_v4 }
  0x38   :  { %625 = vmatpush3.msra.mxu0 %v350_v19 }
  0x39   :  { %626 = vmatprep.subr.mxu0 %v648_v4 }
  0x3a   :  { %627 = vmatpush3.msra.mxu0 %v349_v20 }
  0x3b   :  { %628 = vmatprep.subr.mxu0 %v648_v4 }
  0x3c   :  { %629 = vmatpush3.msra.mxu0 %v348_v21 }
  0x3d   :  { %630 = vmatprep.subr.mxu0 %v648_v4 }
  0x3e   :  { %631 = vmatpush3.msra.mxu0 %v347_v22 }
  0x3f   :  { %632 = vmatprep.subr.mxu0 %v648_v4 }
  0x40   :  { %633 = vmatpush3.msra.mxu0 %v346_v32 }
  0x41   :  { %634 = vmatprep.subr.mxu0 %v648_v4 }
  0x42   :  { %635 = vmatpush3.msra.mxu0 %v345_v33 }
  0xd1   :  { %v253_v23 = vpop.f32.mrf.mxu1 }
  0xd3   :  { %v568_v24 = vpop.f32.mrf.mxu1 }
  0xe2   :  { %v510_v25 = vpop.f32.mrf.mxu0 }
  0xe4   :  { %v511_v26 = vpop.f32.mrf.mxu0 }
  0xe5   :  { %v512_v28 = vadd.f32 %v511_v26, %v510_v25 }
  0xe7   :  { %v184_v29 = vadd.f32 %v512_v28, %v475_v27 }
  0xe9   :  { %v254_v30 = vadd.f32 %v253_v23, %v184_v29 }
  0xeb   :  { %v257_v31 = vmax.f32 %v254_v30, 0.0 }
  0xed   :  { %602 = vmatmul.mubr.f32.vlgmr.msra.gmra.mxu1 %v257_v31 }
 0x1ad   :  { %v340_v34 = vpop.f32.mrf.mxu1 }
 0x1ae   :  { %v344_v35 = vmax.f32 %v340_v34, 0.0 }
 0x1af   :  { %v603_v36 = vpop.f32.mrf.mxu1 }
 0x1b0   :  { %637 = vmatmul.mubr.f32.vlgmr.msra.gmra.mxu0 %v344_v35 }
 0x270   :  { %v427_v37 = vpop.f32.mrf.mxu0 }
 0x271   :  { %v431_v38 = vmax.f32 %v427_v37, 0.0 }
 0x272   :  { %v638_v39 = vpop.f32.mrf.mxu0 }
 0x273   :  { %433 = vst.msk [vmem:[#allocation2] sm:$0xff] %vm432_vm3, %v431_v38 }
 0x27a   :  { %v452_v40 = vld [vmem:[#allocation2] sm:$0x3] }
 0x27b   :  { %453 = vst [vmem:[%s962_s5] sm:$0x3] %v452_v40 }

</bundles_post_ra>
